<compile_context>
chip_gen: v7x
topology: tpu7x:2x2x1
jax: 0.10.0
libtpu: 0.0.40
codegen_flags: <defaults>
</compile_context>

<pallas_src>
import functools

import jax
import jax.numpy as jnp
from jax.experimental import pallas as pl
from jax.experimental.pallas import tpu as pltpu

_EPS = 1e-12  # matches torch.nn.functional.normalize eps
_LANES = 128


def _round_up(x, m):
    return ((x + m - 1) // m) * m


def _nvl_kernel(packed_ref, out_ref, *, has_valid):
    """One (sample b, face-tile j) grid step.

    packed_ref: (1, R, S_TILE, 128) f32.  Row layout (faces on sublanes+lanes):
        0-2  : coord_out[face[:,0]] xyz      9-11 : coord_gt[face[:,0]] xyz
        3-5  : coord_out[face[:,1]] xyz      12-14: coord_gt[face[:,1]] xyz
        6-8  : coord_out[face[:,2]] xyz      15-17: coord_gt[face[:,2]] xyz
        18-20: (optional) per-element validity mask for cos1/cos2/cos3
    out_ref:    (1, 1, 8, 128) f32 — this tile's partial sum (broadcast).
    """

    def vert(base):
        return (packed_ref[0, base + 0, :, :],
                packed_ref[0, base + 1, :, :],
                packed_ref[0, base + 2, :, :])

    o0x, o0y, o0z = vert(0)
    o1x, o1y, o1z = vert(3)
    o2x, o2y, o2z = vert(6)
    g0x, g0y, g0z = vert(9)
    g1x, g1y, g1z = vert(12)
    g2x, g2y, g2z = vert(15)

    def normalize3(x, y, z):
        # 1/max(||v||, eps) == rsqrt(max(||v||^2, eps^2))  -> single EUP push.
        inv = jax.lax.rsqrt(jnp.maximum(x * x + y * y + z * z, _EPS * _EPS))
        return x * inv, y * inv, z * inv

    # Edge vectors computed in-kernel (cheap VPU filler).
    v1ox, v1oy, v1oz = normalize3(o1x - o0x, o1y - o0y, o1z - o0z)
    v2ox, v2oy, v2oz = normalize3(o2x - o0x, o2y - o0y, o2z - o0z)
    v3ox, v3oy, v3oz = normalize3(o2x - o1x, o2y - o1y, o2z - o1z)
    v1gx, v1gy, v1gz = normalize3(g1x - g0x, g1y - g0y, g1z - g0z)
    v2gx, v2gy, v2gz = normalize3(g2x - g0x, g2y - g0y, g2z - g0z)

    # normal_gt = normalize(cross(v1_gt, v2_gt))
    nx = v1gy * v2gz - v1gz * v2gy
    ny = v1gz * v2gx - v1gx * v2gz
    nz = v1gx * v2gy - v1gy * v2gx
    nx, ny, nz = normalize3(nx, ny, nz)

    cos1 = jnp.abs(v1ox * nx + v1oy * ny + v1oz * nz)
    cos2 = jnp.abs(v2ox * nx + v2oy * ny + v2oz * nz)
    cos3 = jnp.abs(v3ox * nx + v3oy * ny + v3oz * nz)

    if has_valid:
        cos1 = cos1 * packed_ref[0, 18, :, :]
        cos2 = cos2 * packed_ref[0, 19, :, :]
        cos3 = cos3 * packed_ref[0, 20, :, :]

    tile_sum = jnp.sum(cos1 + cos2 + cos3)
    out_ref[...] = jnp.full(out_ref.shape, tile_sum, dtype=out_ref.dtype)


def normal_vector_loss(coord_out, coord_gt, face, is_valid=None, *, s_tile=32):
    """Pallas implementation of NormalVectorLoss.forward.  Returns a scalar."""
    B, V, C = coord_out.shape
    assert C == 3 and coord_gt.shape == coord_out.shape
    face = jnp.asarray(face, jnp.int32)
    F = int(face.shape[0])

    # Lane-dense coords: (B, 3, V); gather along the lane axis -> (B, 3, F).
    co = jnp.swapaxes(coord_out.astype(jnp.float32), 1, 2)
    cg = jnp.swapaxes(coord_gt.astype(jnp.float32), 1, 2)
    # TODO(synk): data-dependent vertex gather stays as an XLA gather (not
    # expressible as a rectangular BlockSpec tile).
    rows = [jnp.take(co, face[:, k], axis=2) for k in range(3)]
    rows += [jnp.take(cg, face[:, k], axis=2) for k in range(3)]

    # Validity mask handling (mirrors `loss *= is_valid` before the mean).
    per_sample_valid = None
    has_valid = False
    if is_valid is not None:
        v = jnp.asarray(is_valid, jnp.float32)
        lead = v.shape[0] if v.ndim >= 1 else 1
        if v.size == 1 or (lead in (1, B) and all(int(d) == 1 for d in v.shape[1:])):
            # Per-sample mask (e.g. (B,1,1)): applied to per-sample partial sums
            # in the wrapper -> no broadcast mask materialized.
            per_sample_valid = jnp.broadcast_to(v.reshape((-1,)), (B,))
        else:
            # General per-element mask, broadcast against the (B, 3F, 1) loss.
            vb = jnp.broadcast_to(v, (B, 3 * F, 1)).reshape(B, 3, F)
            rows.append(vb)
            has_valid = True

    packed = jnp.concatenate(rows, axis=1)  # (B, R, F), R = 18 or 21
    R = packed.shape[1]

    # Face tiling: faces occupy sublanes AND lanes -> dense (S_TILE, 128) tiles.
    s_full = -(-F // _LANES)                       # ceil(F / 128)
    s_tile = max(8, (int(s_tile) // 8) * 8)
    S_TILE = min(s_tile, _round_up(s_full, 8))     # multiple of 8, <= s_tile
    Sp = _round_up(s_full, S_TILE)
    Fp = Sp * _LANES
    # Zero-padded faces give zero edges -> cos == 0 -> no effect on the sum.
    packed = jnp.pad(packed, ((0, 0), (0, 0), (0, Fp - F)))
    packed = packed.reshape(B, R, Sp, _LANES)      # free reshape (row-major)

    n_tiles = Sp // S_TILE
    grid = (B, n_tiles)

    cost = pl.CostEstimate(
        flops=120 * F * B,
        transcendentals=6 * F * B,
        bytes_accessed=B * R * Fp * 4 + B * n_tiles * 8 * _LANES * 4)

    partials = pl.pallas_call(
        functools.partial(_nvl_kernel, has_valid=has_valid),
        out_shape=jax.ShapeDtypeStruct((B, n_tiles, 8, _LANES), jnp.float32),
        grid=grid,
        in_specs=[pl.BlockSpec((1, R, S_TILE, _LANES), lambda b, j: (b, 0, j, 0))],
        out_specs=pl.BlockSpec((1, 1, 8, _LANES), lambda b, j: (b, j, 0, 0)),
        compiler_params=pltpu.CompilerParams(
            dimension_semantics=("parallel", "parallel")),
        cost_estimate=cost,
    )(packed)

    per_sample = jnp.sum(partials[:, :, 0, 0], axis=1)  # (B,)
    if per_sample_valid is not None:
        per_sample = per_sample * per_sample_valid
    # torch.mean over the (B, 3F, 1) loss tensor.
    return jnp.sum(per_sample) / (B * 3 * F)


def normal_vector_loss_ref(coord_out, coord_gt, face, is_valid=None):
    """Pure-JAX reference mirroring the PyTorch forward."""
    face = jnp.asarray(face, jnp.int32)

    def normalize(v):
        n = jnp.sqrt(jnp.sum(v * v, axis=2, keepdims=True))
        return v / jnp.maximum(n, _EPS)

    v1o = normalize(coord_out[:, face[:, 1], :] - coord_out[:, face[:, 0], :])
    v2o = normalize(coord_out[:, face[:, 2], :] - coord_out[:, face[:, 0], :])
    v3o = normalize(coord_out[:, face[:, 2], :] - coord_out[:, face[:, 1], :])
    v1g = normalize(coord_gt[:, face[:, 1], :] - coord_gt[:, face[:, 0], :])
    v2g = normalize(coord_gt[:, face[:, 2], :] - coord_gt[:, face[:, 0], :])
    ng = normalize(jnp.cross(v1g, v2g, axis=2))
    cos1 = jnp.abs(jnp.sum(v1o * ng, 2, keepdims=True))
    cos2 = jnp.abs(jnp.sum(v2o * ng, 2, keepdims=True))
    cos3 = jnp.abs(jnp.sum(v3o * ng, 2, keepdims=True))
    loss = jnp.concatenate((cos1, cos2, cos3), 1)
    if is_valid is not None:
        loss = loss * jnp.asarray(is_valid, loss.dtype)
    return jnp.mean(loss)


if __name__ == "__main__":
    key = jax.random.PRNGKey(0)
    k1, k2, k3, k4, k5 = jax.random.split(key, 5)

    # Small mesh consistent with the module: B=2 samples, 64 vertices, 96 faces.
    B, V, F = 2, 64, 96
    coord_out = jax.random.normal(k1, (B, V, 3), dtype=jnp.float32)
    coord_gt = jax.random.normal(k2, (B, V, 3), dtype=jnp.float32)
    face = jax.random.randint(k3, (F, 3), 0, V, dtype=jnp.int32)
    valid = (jax.random.uniform(k4, (B, 1, 1)) > 0.3).astype(jnp.float32)
    valid_full = (jax.random.uniform(k5, (B, 3 * F, 1)) > 0.5).astype(jnp.float32)

    for iv in (None, valid, valid_full):
        got = jax.block_until_ready(normal_vector_loss(coord_out, coord_gt, face, iv))
        want = normal_vector_loss_ref(coord_out, coord_gt, face, iv)
        assert got.shape == ()
        assert jnp.allclose(got, want, atol=1e-4, rtol=1e-4), (got, want)

    print("KERNEL_OK")
</pallas_src>

<mosaic_0001>
module attributes {stable_mosaic.version = 11 : i64} {
  func.func @_nvl_kernel(%arg0: i32, %arg1: i32, %arg2: memref<1x18x8x128xf32, #tpu.memory_space<vmem>>, %arg3: memref<1x1x8x128xf32, #tpu.memory_space<vmem>>) attributes {dimension_semantics = [#tpu.dimension_semantics<parallel>, #tpu.dimension_semantics<parallel>], iteration_bounds = array<i64: 2, 1>, scalar_prefetch = 0 : i64, scratch_operands = 0 : i64, tpu.core_type = #tpu.core_type<tc>, window_params = [{transform_indices = @transform_0, window_bounds = array<i64: 1, 18, 8, 128>}, {transform_indices = @transform_1, window_bounds = array<i64: 1, 1, 8, 128>}]} {
    %c0 = arith.constant 0 : index
    %c0_0 = arith.constant 0 : index
    %c0_1 = arith.constant 0 : index
    %c0_2 = arith.constant 0 : index
    %0 = vector.load %arg2[%c0, %c0_0, %c0_1, %c0_2] : memref<1x18x8x128xf32, #tpu.memory_space<vmem>>, vector<1x1x8x128xf32>
    %1 = vector.shape_cast %0 : vector<1x1x8x128xf32> to vector<8x128xf32>
    %c0_3 = arith.constant 0 : index
    %c1 = arith.constant 1 : index
    %c0_4 = arith.constant 0 : index
    %c0_5 = arith.constant 0 : index
    %2 = vector.load %arg2[%c0_3, %c1, %c0_4, %c0_5] : memref<1x18x8x128xf32, #tpu.memory_space<vmem>>, vector<1x1x8x128xf32>
    %3 = vector.shape_cast %2 : vector<1x1x8x128xf32> to vector<8x128xf32>
    %c0_6 = arith.constant 0 : index
    %c2 = arith.constant 2 : index
    %c0_7 = arith.constant 0 : index
    %c0_8 = arith.constant 0 : index
    %4 = vector.load %arg2[%c0_6, %c2, %c0_7, %c0_8] : memref<1x18x8x128xf32, #tpu.memory_space<vmem>>, vector<1x1x8x128xf32>
    %5 = vector.shape_cast %4 : vector<1x1x8x128xf32> to vector<8x128xf32>
    %c0_9 = arith.constant 0 : index
    %c3 = arith.constant 3 : index
    %c0_10 = arith.constant 0 : index
    %c0_11 = arith.constant 0 : index
    %6 = vector.load %arg2[%c0_9, %c3, %c0_10, %c0_11] : memref<1x18x8x128xf32, #tpu.memory_space<vmem>>, vector<1x1x8x128xf32>
    %7 = vector.shape_cast %6 : vector<1x1x8x128xf32> to vector<8x128xf32>
    %c0_12 = arith.constant 0 : index
    %c4 = arith.constant 4 : index
    %c0_13 = arith.constant 0 : index
    %c0_14 = arith.constant 0 : index
    %8 = vector.load %arg2[%c0_12, %c4, %c0_13, %c0_14] : memref<1x18x8x128xf32, #tpu.memory_space<vmem>>, vector<1x1x8x128xf32>
    %9 = vector.shape_cast %8 : vector<1x1x8x128xf32> to vector<8x128xf32>
    %c0_15 = arith.constant 0 : index
    %c5 = arith.constant 5 : index
    %c0_16 = arith.constant 0 : index
    %c0_17 = arith.constant 0 : index
    %10 = vector.load %arg2[%c0_15, %c5, %c0_16, %c0_17] : memref<1x18x8x128xf32, #tpu.memory_space<vmem>>, vector<1x1x8x128xf32>
    %11 = vector.shape_cast %10 : vector<1x1x8x128xf32> to vector<8x128xf32>
    %c0_18 = arith.constant 0 : index
    %c6 = arith.constant 6 : index
    %c0_19 = arith.constant 0 : index
    %c0_20 = arith.constant 0 : index
    %12 = vector.load %arg2[%c0_18, %c6, %c0_19, %c0_20] : memref<1x18x8x128xf32, #tpu.memory_space<vmem>>, vector<1x1x8x128xf32>
    %13 = vector.shape_cast %12 : vector<1x1x8x128xf32> to vector<8x128xf32>
    %c0_21 = arith.constant 0 : index
    %c7 = arith.constant 7 : index
    %c0_22 = arith.constant 0 : index
    %c0_23 = arith.constant 0 : index
    %14 = vector.load %arg2[%c0_21, %c7, %c0_22, %c0_23] : memref<1x18x8x128xf32, #tpu.memory_space<vmem>>, vector<1x1x8x128xf32>
    %15 = vector.shape_cast %14 : vector<1x1x8x128xf32> to vector<8x128xf32>
    %c0_24 = arith.constant 0 : index
    %c8 = arith.constant 8 : index
    %c0_25 = arith.constant 0 : index
    %c0_26 = arith.constant 0 : index
    %16 = vector.load %arg2[%c0_24, %c8, %c0_25, %c0_26] : memref<1x18x8x128xf32, #tpu.memory_space<vmem>>, vector<1x1x8x128xf32>
    %17 = vector.shape_cast %16 : vector<1x1x8x128xf32> to vector<8x128xf32>
    %c0_27 = arith.constant 0 : index
    %c9 = arith.constant 9 : index
    %c0_28 = arith.constant 0 : index
    %c0_29 = arith.constant 0 : index
    %18 = vector.load %arg2[%c0_27, %c9, %c0_28, %c0_29] : memref<1x18x8x128xf32, #tpu.memory_space<vmem>>, vector<1x1x8x128xf32>
    %19 = vector.shape_cast %18 : vector<1x1x8x128xf32> to vector<8x128xf32>
    %c0_30 = arith.constant 0 : index
    %c10 = arith.constant 10 : index
    %c0_31 = arith.constant 0 : index
    %c0_32 = arith.constant 0 : index
    %20 = vector.load %arg2[%c0_30, %c10, %c0_31, %c0_32] : memref<1x18x8x128xf32, #tpu.memory_space<vmem>>, vector<1x1x8x128xf32>
    %21 = vector.shape_cast %20 : vector<1x1x8x128xf32> to vector<8x128xf32>
    %c0_33 = arith.constant 0 : index
    %c11 = arith.constant 11 : index
    %c0_34 = arith.constant 0 : index
    %c0_35 = arith.constant 0 : index
    %22 = vector.load %arg2[%c0_33, %c11, %c0_34, %c0_35] : memref<1x18x8x128xf32, #tpu.memory_space<vmem>>, vector<1x1x8x128xf32>
    %23 = vector.shape_cast %22 : vector<1x1x8x128xf32> to vector<8x128xf32>
    %c0_36 = arith.constant 0 : index
    %c12 = arith.constant 12 : index
    %c0_37 = arith.constant 0 : index
    %c0_38 = arith.constant 0 : index
    %24 = vector.load %arg2[%c0_36, %c12, %c0_37, %c0_38] : memref<1x18x8x128xf32, #tpu.memory_space<vmem>>, vector<1x1x8x128xf32>
    %25 = vector.shape_cast %24 : vector<1x1x8x128xf32> to vector<8x128xf32>
    %c0_39 = arith.constant 0 : index
    %c13 = arith.constant 13 : index
    %c0_40 = arith.constant 0 : index
    %c0_41 = arith.constant 0 : index
    %26 = vector.load %arg2[%c0_39, %c13, %c0_40, %c0_41] : memref<1x18x8x128xf32, #tpu.memory_space<vmem>>, vector<1x1x8x128xf32>
    %27 = vector.shape_cast %26 : vector<1x1x8x128xf32> to vector<8x128xf32>
    %c0_42 = arith.constant 0 : index
    %c14 = arith.constant 14 : index
    %c0_43 = arith.constant 0 : index
    %c0_44 = arith.constant 0 : index
    %28 = vector.load %arg2[%c0_42, %c14, %c0_43, %c0_44] : memref<1x18x8x128xf32, #tpu.memory_space<vmem>>, vector<1x1x8x128xf32>
    %29 = vector.shape_cast %28 : vector<1x1x8x128xf32> to vector<8x128xf32>
    %c0_45 = arith.constant 0 : index
    %c15 = arith.constant 15 : index
    %c0_46 = arith.constant 0 : index
    %c0_47 = arith.constant 0 : index
    %30 = vector.load %arg2[%c0_45, %c15, %c0_46, %c0_47] : memref<1x18x8x128xf32, #tpu.memory_space<vmem>>, vector<1x1x8x128xf32>
    %31 = vector.shape_cast %30 : vector<1x1x8x128xf32> to vector<8x128xf32>
    %c0_48 = arith.constant 0 : index
    %c16 = arith.constant 16 : index
    %c0_49 = arith.constant 0 : index
    %c0_50 = arith.constant 0 : index
    %32 = vector.load %arg2[%c0_48, %c16, %c0_49, %c0_50] : memref<1x18x8x128xf32, #tpu.memory_space<vmem>>, vector<1x1x8x128xf32>
    %33 = vector.shape_cast %32 : vector<1x1x8x128xf32> to vector<8x128xf32>
    %c0_51 = arith.constant 0 : index
    %c17 = arith.constant 17 : index
    %c0_52 = arith.constant 0 : index
    %c0_53 = arith.constant 0 : index
    %34 = vector.load %arg2[%c0_51, %c17, %c0_52, %c0_53] : memref<1x18x8x128xf32, #tpu.memory_space<vmem>>, vector<1x1x8x128xf32>
    %35 = vector.shape_cast %34 : vector<1x1x8x128xf32> to vector<8x128xf32>
    %36 = arith.subf %7, %1 : vector<8x128xf32>
    %37 = arith.subf %9, %3 : vector<8x128xf32>
    %38 = arith.subf %11, %5 : vector<8x128xf32>
    %39 = arith.mulf %36, %36 : vector<8x128xf32>
    %40 = arith.mulf %37, %37 : vector<8x128xf32>
    %41 = arith.addf %39, %40 : vector<8x128xf32>
    %42 = arith.mulf %38, %38 : vector<8x128xf32>
    %43 = arith.addf %41, %42 : vector<8x128xf32>
    %cst = arith.constant 1.000000e-24 : f32
    %44 = vector.broadcast %cst : f32 to vector<8x128xf32>
    %45 = arith.maximumf %43, %44 : vector<8x128xf32>
    %46 = math.rsqrt %45 : vector<8x128xf32>
    %47 = arith.mulf %36, %46 : vector<8x128xf32>
    %48 = arith.mulf %37, %46 : vector<8x128xf32>
    %49 = arith.mulf %38, %46 : vector<8x128xf32>
    %50 = arith.subf %13, %1 : vector<8x128xf32>
    %51 = arith.subf %15, %3 : vector<8x128xf32>
    %52 = arith.subf %17, %5 : vector<8x128xf32>
    %53 = arith.mulf %50, %50 : vector<8x128xf32>
    %54 = arith.mulf %51, %51 : vector<8x128xf32>
    %55 = arith.addf %53, %54 : vector<8x128xf32>
    %56 = arith.mulf %52, %52 : vector<8x128xf32>
    %57 = arith.addf %55, %56 : vector<8x128xf32>
    %cst_54 = arith.constant 1.000000e-24 : f32
    %58 = vector.broadcast %cst_54 : f32 to vector<8x128xf32>
    %59 = arith.maximumf %57, %58 : vector<8x128xf32>
    %60 = math.rsqrt %59 : vector<8x128xf32>
    %61 = arith.mulf %50, %60 : vector<8x128xf32>
    %62 = arith.mulf %51, %60 : vector<8x128xf32>
    %63 = arith.mulf %52, %60 : vector<8x128xf32>
    %64 = arith.subf %13, %7 : vector<8x128xf32>
    %65 = arith.subf %15, %9 : vector<8x128xf32>
    %66 = arith.subf %17, %11 : vector<8x128xf32>
    %67 = arith.mulf %64, %64 : vector<8x128xf32>
    %68 = arith.mulf %65, %65 : vector<8x128xf32>
    %69 = arith.addf %67, %68 : vector<8x128xf32>
    %70 = arith.mulf %66, %66 : vector<8x128xf32>
    %71 = arith.addf %69, %70 : vector<8x128xf32>
    %cst_55 = arith.constant 1.000000e-24 : f32
    %72 = vector.broadcast %cst_55 : f32 to vector<8x128xf32>
    %73 = arith.maximumf %71, %72 : vector<8x128xf32>
    %74 = math.rsqrt %73 : vector<8x128xf32>
    %75 = arith.mulf %64, %74 : vector<8x128xf32>
    %76 = arith.mulf %65, %74 : vector<8x128xf32>
    %77 = arith.mulf %66, %74 : vector<8x128xf32>
    %78 = arith.subf %25, %19 : vector<8x128xf32>
    %79 = arith.subf %27, %21 : vector<8x128xf32>
    %80 = arith.subf %29, %23 : vector<8x128xf32>
    %81 = arith.mulf %78, %78 : vector<8x128xf32>
    %82 = arith.mulf %79, %79 : vector<8x128xf32>
    %83 = arith.addf %81, %82 : vector<8x128xf32>
    %84 = arith.mulf %80, %80 : vector<8x128xf32>
    %85 = arith.addf %83, %84 : vector<8x128xf32>
    %cst_56 = arith.constant 1.000000e-24 : f32
    %86 = vector.broadcast %cst_56 : f32 to vector<8x128xf32>
    %87 = arith.maximumf %85, %86 : vector<8x128xf32>
    %88 = math.rsqrt %87 : vector<8x128xf32>
    %89 = arith.mulf %78, %88 : vector<8x128xf32>
    %90 = arith.mulf %79, %88 : vector<8x128xf32>
    %91 = arith.mulf %80, %88 : vector<8x128xf32>
    %92 = arith.subf %31, %19 : vector<8x128xf32>
    %93 = arith.subf %33, %21 : vector<8x128xf32>
    %94 = arith.subf %35, %23 : vector<8x128xf32>
    %95 = arith.mulf %92, %92 : vector<8x128xf32>
    %96 = arith.mulf %93, %93 : vector<8x128xf32>
    %97 = arith.addf %95, %96 : vector<8x128xf32>
    %98 = arith.mulf %94, %94 : vector<8x128xf32>
    %99 = arith.addf %97, %98 : vector<8x128xf32>
    %cst_57 = arith.constant 1.000000e-24 : f32
    %100 = vector.broadcast %cst_57 : f32 to vector<8x128xf32>
    %101 = arith.maximumf %99, %100 : vector<8x128xf32>
    %102 = math.rsqrt %101 : vector<8x128xf32>
    %103 = arith.mulf %92, %102 : vector<8x128xf32>
    %104 = arith.mulf %93, %102 : vector<8x128xf32>
    %105 = arith.mulf %94, %102 : vector<8x128xf32>
    %106 = arith.mulf %90, %105 : vector<8x128xf32>
    %107 = arith.mulf %91, %104 : vector<8x128xf32>
    %108 = arith.subf %106, %107 : vector<8x128xf32>
    %109 = arith.mulf %91, %103 : vector<8x128xf32>
    %110 = arith.mulf %89, %105 : vector<8x128xf32>
    %111 = arith.subf %109, %110 : vector<8x128xf32>
    %112 = arith.mulf %89, %104 : vector<8x128xf32>
    %113 = arith.mulf %90, %103 : vector<8x128xf32>
    %114 = arith.subf %112, %113 : vector<8x128xf32>
    %115 = arith.mulf %108, %108 : vector<8x128xf32>
    %116 = arith.mulf %111, %111 : vector<8x128xf32>
    %117 = arith.addf %115, %116 : vector<8x128xf32>
    %118 = arith.mulf %114, %114 : vector<8x128xf32>
    %119 = arith.addf %117, %118 : vector<8x128xf32>
    %cst_58 = arith.constant 1.000000e-24 : f32
    %120 = vector.broadcast %cst_58 : f32 to vector<8x128xf32>
    %121 = arith.maximumf %119, %120 : vector<8x128xf32>
    %122 = math.rsqrt %121 : vector<8x128xf32>
    %123 = arith.mulf %108, %122 : vector<8x128xf32>
    %124 = arith.mulf %111, %122 : vector<8x128xf32>
    %125 = arith.mulf %114, %122 : vector<8x128xf32>
    %126 = arith.mulf %47, %123 : vector<8x128xf32>
    %127 = arith.mulf %48, %124 : vector<8x128xf32>
    %128 = arith.addf %126, %127 : vector<8x128xf32>
    %129 = arith.mulf %49, %125 : vector<8x128xf32>
    %130 = arith.addf %128, %129 : vector<8x128xf32>
    %131 = math.absf %130 : vector<8x128xf32>
    %132 = arith.mulf %61, %123 : vector<8x128xf32>
    %133 = arith.mulf %62, %124 : vector<8x128xf32>
    %134 = arith.addf %132, %133 : vector<8x128xf32>
    %135 = arith.mulf %63, %125 : vector<8x128xf32>
    %136 = arith.addf %134, %135 : vector<8x128xf32>
    %137 = math.absf %136 : vector<8x128xf32>
    %138 = arith.mulf %75, %123 : vector<8x128xf32>
    %139 = arith.mulf %76, %124 : vector<8x128xf32>
    %140 = arith.addf %138, %139 : vector<8x128xf32>
    %141 = arith.mulf %77, %125 : vector<8x128xf32>
    %142 = arith.addf %140, %141 : vector<8x128xf32>
    %143 = math.absf %142 : vector<8x128xf32>
    %144 = arith.addf %131, %137 : vector<8x128xf32>
    %145 = arith.addf %144, %143 : vector<8x128xf32>
    %146 = vector.shape_cast %145 : vector<8x128xf32> to vector<1x8x128xf32>
    %cst_59 = arith.constant dense<0.000000e+00> : vector<1xf32>
    %147 = vector.multi_reduction <add>, %146, %cst_59 [1, 2] : vector<1x8x128xf32> to vector<1xf32>
    %148 = vector.shape_cast %147 : vector<1xf32> to vector<1x1x1xf32>
    %149 = vector.extract %148[0, 0, 0] : f32 from vector<1x1x1xf32>
    %150 = vector.broadcast %149 : f32 to vector<1x1x8x128xf32>
    %c0_60 = arith.constant 0 : index
    %c0_61 = arith.constant 0 : index
    %c0_62 = arith.constant 0 : index
    %c0_63 = arith.constant 0 : index
    %151 = vector.load %arg3[%c0_60, %c0_61, %c0_62, %c0_63] : memref<1x1x8x128xf32, #tpu.memory_space<vmem>>, vector<1x1x8x128xf32>
    tpu.vector_store %arg3[%c0_60, %c0_61, %c0_62, %c0_63], %150 {strides = array<i32>} : memref<1x1x8x128xf32, #tpu.memory_space<vmem>>, vector<1x1x8x128xf32>,
    return
  }
  func.func @transform_0(%arg0: i32, %arg1: i32) -> (i32, i32, i32, i32) {
    %c0_i32 = arith.constant 0 : i32
    %c0_i32_0 = arith.constant 0 : i32
    %c0_i32_1 = arith.constant 0 : i32
    return %arg0, %c0_i32, %arg1, %c0_i32_0 : i32, i32, i32, i32
  }
  func.func @transform_1(%arg0: i32, %arg1: i32) -> (i32, i32, i32, i32) {
    %c0_i32 = arith.constant 0 : i32
    %c0_i32_0 = arith.constant 0 : i32
    %c0_i32_1 = arith.constant 0 : i32
    return %arg0, %arg1, %c0_i32, %c0_i32_0 : i32, i32, i32, i32
  }
}

</mosaic_0001>

<bundles_post_ra>
// kernel: tpu_custom_call.1
= control target key start
LH: loop header
LB: loop body
LE: loop exit
PB: predicated region body
PF: predicated region fallthrough
CT: control target
= control target key end

     0   :  { %6 = vsyncpa [#allocation3], 0  ;;  %s829_s0 = inlined_call_operand.hbm [shape: f32[2,18,8,128], index: 0, kind: input, shape index: {}]   ;;  %s830_s1 = inlined_call_operand.hbm [shape: f32[2,1,8,128], index: 1, kind: output, shape index: {}]  }
   0x1   :  { %8 = vsyncpa [#allocation3 + $0x1], 0 }
   0x2   :  { %9 = vsyncpa [#allocation4], 0 }
   0x3   :  { %11 = vsyncpa [#allocation4 + $0x1], 0  ;;  %s635_s6 = smov 0   ;;  %s637_s7 = smov 0  }
   0x4   :  { %s639_s8 = smov 0   ;;  %s641_s9 = smov 0  }
   0x5   :  { %s643_s10 = smov 0   ;;  %s645_s11 = smov 0  }
   0x6 LB: > { %s398_s12 = sadd.s32 4294967295, %s619_s11   ;;  %s399_s13 = sadd.s32 4294967294, %s619_s11   ;;  %s619_s11 = sphi %s645_s11, %s17_s11   ;;  %s615_s10 = sphi %s643_s10, %s845_s10   ;;  %s611_s9 = sphi %s641_s9, %s844_s9   ;;  %s607_s8 = sphi %s639_s8, %s843_s8   ;;  %s603_s7 = sphi %s637_s7, %s842_s7   ;;  %s599_s6 = sphi %s635_s6, %s841_s6  }
   0x7   : > { %s29_s14 = sadd.s32 1, %s615_s10  ;;  %s38_s15 = sadd.s32 1, %s607_s8 }
   0x8   : > { %p31_p0 = scmp.ge.s32.totalorder %s29_s14, 2  ;;  %p45_p1 = scmp.ne.s32.totalorder %s607_s8, %s603_s7 }
   0x9   : > { %p46_p2 = scmp.eq.s32.totalorder %s619_s11, 0  ;;  %p51_p3 = scmp.ne.s32.totalorder %s603_s7, %s599_s6 }
   0xa   : > { %s847_s14 = smov (%p31_p0, %s29_s14), 0  ;;  %p52_p5 = scmp.eq.s32.totalorder %s398_s12, 0 }
   0xb   : > { %p676_p4 = por %p46_p2, %p45_p1  ;;  %s33_s17 = ssub.s32 %s615_s10, %s847_s14 }
   0xc   : > { %p77_p6 = scmp.eq.s32.totalorder %s398_s12, 1  ;;  %p36_p7 = scmp.eq.s32.totalorder %s33_s17, 0 }
   0xd   : > { %p682_p8 = por %p52_p5, %p51_p3  ;;  %p83_p10 = scmp.eq.s32.totalorder %s399_s13, 1 }
   0xe   : > { %p686_p9 = por %p77_p6, %p45_p1  ;;  %p443_p13 = scmp.lt.s32.totalorder %s619_s11, 2 }
   0xf   : > { %s691_s20 = scalar_select %p36_p7, %s607_s8, %s38_s15  }
  0x10   : > { %s834_s19 = scalar_select %p686_p9, 1, 0 }
  0x11   : > { %p693_p11 = por %p83_p10, %p51_p3  ;;  %s103_s22 = sand.u32 1, %s607_s8  }
  0x12   : > { %s426_s23 = smul.u32 144, %s103_s22  ;;  %p703_p0 = pnand %p443_p13, %p676_p4 }
  0x13   : > { %s835_s21 = scalar_select %p693_p11, 1, 0 }
  0x14   : > { %s427_s24 = smul.u32 2304, %s615_s10  ;;  %s107_s29 = scalar_lea.vmem [#allocation2], %s426_s23 }
  0x15   : > { %s115_s30 = sshll.u32 %s107_s29, 4  ;;  %s715_s2 = scalar_lea.sflag [#allocation3], %s103_s22  ;;  %s712_s30 = int_to_ptr.vmem [resolvable:$true] %s115_s30 }
  0x16   : > { %s710_s28 = scalar_lea.hbm %s829_s0, %s427_s24  ;;  %p509_p3 = pneg %p703_p0 }
  0x17   : > { %s507_s3 = scalar_lea.hbm %s710_s28, 2304  ;;  %s512_s12 = scalar_lea.hbm %s829_s0, 4608 }
  0x18   : > { %p508_p2 = scmp.ne.s32.totalorder %s710_s28, %s507_s3  ;;  %p513_p6 = scmp.lt.u32.totalorder %s710_s28, %s829_s0 }
  0x19   : > { %p514_p7 = scmp.lt.u32.totalorder %s512_s12, %s507_s3  ;;  %p516_p13 = scmp.lt.u32.totalorder %s507_s3, %s710_s28 }
  0x1a   : > { %p510_p4 = pnand %p509_p3, %p508_p2 }
  0x1b   : > { %p515_p10 = por %p514_p7, %p513_p6 }
  0x1c   : > { %p511_p5 = pneg %p510_p4 }
  0x1d   : > { %p517_p12 = por %p516_p13, %p515_p10 }
  0x1f   : > { %p518_p1 = pnand %p517_p12, %p511_p5 }
  0x21   : > { %521 = shalt.err (!%p518_p1)
}
  0x22   : > { %s522_s16 = scalar_lea.vmem %s712_s30, 2304  ;;  %s621_s17 = smov [#allocation2]  }
  0x23   : > { %p523_p2 = scmp.ne.s32.totalorder %s712_s30, %s522_s16  ;;  %s527_s22 = sshll.u32 %s621_s17, 4  ;;  %s528_s22 = int_to_ptr.vmem [resolvable:$false] %s527_s22 }
  0x24   : > { %s529_s23 = scalar_lea.vmem %s528_s22, 4608  ;;  %p530_p9 = scmp.lt.s32.totalorder %s712_s30, %s528_s22 }
  0x25   : > { %p525_p4 = pnand %p523_p2, %p509_p3  ;;  %p531_p6 = scmp.lt.s32.totalorder %s529_s23, %s522_s16 }
  0x27   : > { %p526_p11 = pneg %p525_p4  ;;  %p532_p7 = por %p531_p6, %p530_p9 }
  0x29   : > { %p533_p10 = pnand %p532_p7, %p526_p11 }
  0x2b   : > { %536 = shalt.err (!%p533_p10)
}
  0x2c   : > { %s622_s24 = smov 128   ;;  %s623_s26 = smov 8  }
  0x2d   : > { %438 = dma.hbm_to_vmem [thread:$0]  (!%p703_p0), %s710_s28, 2304, %s712_s30, %s715_s2, %s622_s24, %s622_s24, %s623_s26  }
  0x2e   : > { %p123_p12 = scmp.lt.s32.totalorder %s619_s11, 3  ;;  %p837_p1 = scmp.ge.s32.totalorder %s619_s11, 1 }
  0x30   : > { %p124_p3 = pnand %p837_p1, %p123_p12 }
  0x31   : > { %s747_s27 = sand.u32 (!%p124_p3), 1, %s603_s7  }
  0x32   : > { %127 = sbr.rel (%p124_p3) target bundleno = 341 (0x155), region = 24  ;;  %s130_s3 = scalar_lea.sflag (!%p124_p3), [#allocation3], %s747_s27 }
  0x33   : > { %s428_s29 = smul.u32 (!%p124_p3), 144, %s747_s27 }
  0x35   : > { %s751_s4 = scalar_lea.vmem (!%p124_p3), [#allocation2], %s428_s29 }
  0x39   : > { %590 = dma.done.wait (%p682_p8), %s130_s3, 2304  }
  0x3a   : > { %592 = vsyncadd (%p682_p8), %s130_s3, 4294964992  ;;  %v413_v0 = vld [vmem:[%s751_s4 + $0x48] sm:$0xff]  ;;  %v414_v1 = vld [vmem:[%s751_s4 + $0x50] sm:$0xff]  ;;  %s404_s18 = sshll.u32 %s747_s27, 3  ;;  %s423_s30 = sshll.u32 %s611_s9, 7 }
  0x3b   : > { %v415_v2 = vld [vmem:[%s751_s4 + $0x58] sm:$0xff]  ;;  %v416_v3 = vld [vmem:[%s751_s4 + $0x60] sm:$0xff]  ;;  %v417_v4 = vld [vmem:[%s751_s4 + $0x68] sm:$0xff]  ;;  %s151_s25 = scalar_lea.vmem [#allocation5], %s404_s18  ;;  %s782_s13 = scalar_lea.hbm %s830_s1, %s423_s30 }
  0x3c   : > { %v418_v5 = vld [vmem:[%s751_s4 + $0x70] sm:$0xff]  ;;  %v419_v6 = vld [vmem:[%s751_s4 + $0x78] sm:$0xff]  ;;  %v420_v7 = vld [vmem:[%s751_s4 + $0x80] sm:$0xff]  ;;  %v226_v8 = vsub.f32 %v416_v3, %v413_v0  ;;  %v227_v10 = vsub.f32 %v417_v4, %v414_v1  ;;  %s317_s28 = sshll.u32 %s151_s25, 4  ;;  %s303_s15 = scalar_lea.sflag [#allocation4], %s747_s27  ;;  %s777_s28 = int_to_ptr.vmem [resolvable:$true] %s317_s28 }
  0x3d   : > { %v421_v9 = vld [vmem:[%s751_s4 + $0x88] sm:$0xff]  ;;  %v228_v11 = vsub.f32 %v418_v5, %v415_v2  ;;  %v239_v13 = vsub.f32 %v419_v6, %v413_v0  ;;  %v240_v16 = vsub.f32 %v420_v7, %v414_v1  ;;  %v152_v24 = vld [vmem:[%s751_s4] sm:$0xff]  ;;  %v407_v26 = vld [vmem:[%s751_s4 + $0x18] sm:$0xff]  ;;  %s537_s16 = scalar_lea.vmem %s777_s28, 128  ;;  %p838_p9 = scmp.ne.s32.totalorder %s834_s19, 0 }
  0x3e   : > { %v229_v12 = vmul.f32 %v226_v8, %v226_v8  ;;  %v230_v14 = vmul.f32 %v227_v10, %v227_v10  ;;  %v241_v17 = vsub.f32 %v421_v9, %v415_v2  ;;  %v405_v25 = vld [vmem:[%s751_s4 + $0x8] sm:$0xff]  ;;  %v408_v29 = vld [vmem:[%s751_s4 + $0x20] sm:$0xff]  ;;  %v410_v30 = vld [vmem:[%s751_s4 + $0x30] sm:$0xff]  ;;  %v187_v33 = vsub.f32 %v407_v26, %v152_v24  ;;  %p538_p8 = scmp.ne.s32.totalorder %s777_s28, %s537_s16  ;;  %s624_s9 = smov [#allocation5]  }
  0x3f   : > { %v232_v15 = vmul.f32 %v228_v11, %v228_v11  ;;  %v242_v18 = vmul.f32 %v239_v13, %v239_v13  ;;  %v243_v20 = vmul.f32 %v240_v16, %v240_v16  ;;  %v411_v31 = vld [vmem:[%s751_s4 + $0x38] sm:$0xff]  ;;  %v406_v34 = vld [vmem:[%s751_s4 + $0x10] sm:$0xff]  ;;  %v409_v35 = vld [vmem:[%s751_s4 + $0x28] sm:$0xff]  ;;  %v188_v37 = vsub.f32 %v408_v29, %v405_v25  ;;  %s541_s17 = sshll.u32 %s624_s9, 4  ;;  %s542_s17 = int_to_ptr.vmem [resolvable:$false] %s541_s17 }
  0x40   : > { %v231_v19 = vadd.f32 %v230_v14, %v229_v12  ;;  %v245_v21 = vmul.f32 %v241_v17, %v241_v17  ;;  %v412_v36 = vld [vmem:[%s751_s4 + $0x40] sm:$0xff]  ;;  %v200_v38 = vsub.f32 %v410_v30, %v152_v24  ;;  %v201_v39 = vsub.f32 %v411_v31, %v405_v25  ;;  %p539_p11 = pnand %p538_p8, %p838_p9  ;;  %s543_s22 = scalar_lea.vmem %s542_s17, 256 }
  0x41   : > { %v244_v23 = vadd.f32 %v243_v20, %v242_v18  ;;  %v213_v40 = vsub.f32 %v410_v30, %v407_v26  ;;  %v214_v41 = vsub.f32 %v411_v31, %v408_v29  ;;  %v189_v42 = vsub.f32 %v409_v35, %v406_v34  ;;  %p544_p5 = scmp.lt.s32.totalorder %s777_s28, %s542_s17  ;;  %p545_p13 = scmp.lt.s32.totalorder %s543_s22, %s537_s16 }
  0x42   : > { %v233_v22 = vadd.f32 %v232_v15, %v231_v19  ;;  %v202_v43 = vsub.f32 %v412_v36, %v406_v34  ;;  %v190_v44 = vmul.f32 %v187_v33, %v187_v33  ;;  %v191_v45 = vmul.f32 %v188_v37, %v188_v37  ;;  %p540_p0 = pneg %p539_p11 }
  0x43   : > { %v246_v28 = vadd.f32 %v245_v21, %v244_v23  ;;  %v203_v46 = vmul.f32 %v200_v38, %v200_v38  ;;  %v204_v47 = vmul.f32 %v201_v39, %v201_v39  ;;  %v215_v48 = vsub.f32 %v412_v36, %v409_v35  ;;  %p546_p2 = por %p545_p13, %p544_p5 }
  0x44   : > { %v234_v27 = vmax.f32 %v233_v22, 1e-24  ;;  %v216_v49 = vmul.f32 %v213_v40, %v213_v40  ;;  %v217_v50 = vmul.f32 %v214_v41, %v214_v41  ;;  %v192_v52 = vadd.f32 %v191_v45, %v190_v44 }
  0x45   : > { %v247_v32 = vmax.f32 %v246_v28, 1e-24  ;;  %v193_v53 = vmul.f32 %v189_v42, %v189_v42  ;;  %v205_v54 = vadd.f32 %v204_v47, %v203_v46  ;;  %v206_v55 = vmul.f32 %v202_v43, %v202_v43  ;;  %p547_p4 = pnand %p546_p2, %p540_p0 }
  0x46   : > { %495 = vrsqrt.f32 %v234_v27  ;;  %v218_v60 = vadd.f32 %v217_v50, %v216_v49  ;;  %v219_v61 = vmul.f32 %v215_v48, %v215_v48 }
  0x47   : > { %497 = vrsqrt.f32 %v247_v32  ;;  %v194_v1 = vadd.f32 %v193_v53, %v192_v52  ;;  %v207_v2 = vadd.f32 %v206_v55, %v205_v54 }
  0x48   : > { %v220_v7 = vadd.f32 %v219_v61, %v218_v60 }
  0x4a   : > { %v221_v20 = vmax.f32 %v220_v7, 1e-24 }
  0x50   : > { %v496_v51 = vpop.eup %495 }
  0x51   : > { %v236_v56 = vmul.f32 %v496_v51, %v226_v8  ;;  %v237_v57 = vmul.f32 %v496_v51, %v227_v10  ;;  %v238_v58 = vmul.f32 %v496_v51, %v228_v11  ;;  %v498_v59 = vpop.eup %497  ;;  %v195_v8 = vmax.f32 %v194_v1, 1e-24 }
  0x52   : > { %v249_v62 = vmul.f32 %v498_v59, %v239_v13  ;;  %v250_v63 = vmul.f32 %v498_v59, %v240_v16  ;;  %v251_v0 = vmul.f32 %v498_v59, %v241_v17  ;;  %v208_v11 = vmax.f32 %v207_v2, 1e-24 }
  0x53   : > { %499 = vrsqrt.f32 %v195_v8 }
  0x54   : > { %v252_v3 = vmul.f32 %v251_v0, %v237_v57  ;;  %v253_v4 = vmul.f32 %v250_v63, %v238_v58  ;;  %v255_v5 = vmul.f32 %v249_v62, %v238_v58  ;;  %v256_v6 = vmul.f32 %v251_v0, %v236_v56 }
  0x55   : > { %v258_v9 = vmul.f32 %v250_v63, %v236_v56  ;;  %v259_v12 = vmul.f32 %v249_v62, %v237_v57  ;;  %501 = vrsqrt.f32 %v208_v11 }
  0x56   : > { %v254_v14 = vsub.f32 %v252_v3, %v253_v4  ;;  %v257_v15 = vsub.f32 %v255_v5, %v256_v6  ;;  %503 = vrsqrt.f32 %v221_v20 }
  0x57   : > { %v260_v10 = vsub.f32 %v258_v9, %v259_v12 }
  0x58   : > { %v261_v18 = vmul.f32 %v254_v14, %v254_v14  ;;  %v262_v19 = vmul.f32 %v257_v15, %v257_v15 }
  0x59   : > { %v264_v13 = vmul.f32 %v260_v10, %v260_v10 }
  0x5a   : > { %v263_v16 = vadd.f32 %v262_v19, %v261_v18 }
  0x5c   : > { %v265_v17 = vadd.f32 %v264_v13, %v263_v16 }
  0x5d   : > { %v500_v22 = vpop.eup %499 }
  0x5e   : > { %v266_v21 = vmax.f32 %v265_v17, 1e-24  ;;  %v197_v25 = vmul.f32 %v500_v22, %v187_v33  ;;  %v198_v26 = vmul.f32 %v500_v22, %v188_v37  ;;  %v199_v27 = vmul.f32 %v500_v22, %v189_v42 }
  0x5f   : > { %v502_v23 = vpop.eup %501 }
  0x60   : > { %505 = vrsqrt.f32 %v266_v21  ;;  %v504_v24 = vpop.eup %503  ;;  %v210_v28 = vmul.f32 %v502_v23, %v200_v38  ;;  %v211_v30 = vmul.f32 %v502_v23, %v201_v39  ;;  %v212_v31 = vmul.f32 %v502_v23, %v202_v43 }
  0x61   : > { %v223_v32 = vmul.f32 %v504_v24, %v213_v40  ;;  %v224_v34 = vmul.f32 %v504_v24, %v214_v41  ;;  %v225_v35 = vmul.f32 %v504_v24, %v215_v48 }
  0x6a   : > { %v506_v29 = vpop.eup %505 }
  0x6b   : > { %v268_v36 = vmul.f32 %v506_v29, %v254_v14  ;;  %v269_v44 = vmul.f32 %v506_v29, %v257_v15  ;;  %v270_v45 = vmul.f32 %v506_v29, %v260_v10 }
  0x6d   : > { %v271_v46 = vmul.f32 %v268_v36, %v197_v25  ;;  %v272_v47 = vmul.f32 %v269_v44, %v198_v26  ;;  %v274_v49 = vmul.f32 %v270_v45, %v199_v27  ;;  %v277_v50 = vmul.f32 %v268_v36, %v210_v28 }
  0x6e   : > { %v278_v51 = vmul.f32 %v269_v44, %v211_v30  ;;  %v280_v52 = vmul.f32 %v270_v45, %v212_v31  ;;  %v283_v53 = vmul.f32 %v268_v36, %v223_v32  ;;  %v284_v33 = vmul.f32 %v269_v44, %v224_v34 }
  0x6f   : > { %v273_v37 = vadd.f32 %v272_v47, %v271_v46  ;;  %v286_v42 = vmul.f32 %v270_v45, %v225_v35 }
  0x70   : > { %v279_v38 = vadd.f32 %v278_v51, %v277_v50  ;;  %v285_v54 = vadd.f32 %v284_v33, %v283_v53 }
  0x71   : > { %v275_v39 = vadd.f32 %v274_v49, %v273_v37 }
  0x72   : > { %v281_v43 = vadd.f32 %v280_v52, %v279_v38  ;;  %v287_v40 = vadd.f32 %v286_v42, %v285_v54 }
  0x73   : > { %v276_v41 = vand.u32 2147483647, %v275_v39 }
  0x74   : > { %v282_v48 = vand.u32 2147483647, %v281_v43  ;;  %v288_v55 = vand.u32 2147483647, %v287_v40 }
  0x76   : > { %v289_v56 = vadd.f32 %v282_v48, %v276_v41 }
  0x78   : > { %v290_v57 = vadd.f32 %v289_v56, %v288_v55 }
  0x7a   : > { %291 = vadd.xlane.f32.xlu0 %v290_v57 }
 0x107   : > { %v292_v58 = vpop.xlane.xlu0 %291 }
 0x108   : > { %v293_v59 = vrot.slane %v292_v58, 4 }
 0x10a   : > { %v294_v60 = vadd.f32 %v293_v59, %v292_v58 }
 0x10c   : > { %v295_v61 = vrot.slane %v294_v60, 2 }
 0x10e   : > { %v296_v62 = vadd.f32 %v295_v61, %v294_v60 }
 0x110   : > { %v297_v63 = vrot.slane %v296_v62, 1 }
 0x112   : > { %v298_v0 = vadd.f32 %v297_v63, %v296_v62 }
 0x114   : > { %429 = vpush %v298_v0 }
 0x145   : > { %s430_s2 = spop %429 }
 0x146   : > { %v300_v1 = vstv %s430_s2 }
 0x147   : > { %301 = vst [vmem:[%s151_s25] sm:$0xff] %v300_v1 }
 0x148   : > { %550 = shalt.err (!%p547_p4)
}
 0x149   : > { %s551_s23 = scalar_lea.hbm %s782_s13, 128  ;;  %s555_s27 = scalar_lea.hbm %s830_s1, 256 }
 0x14a   : > { %p552_p6 = scmp.ne.s32.totalorder %s782_s13, %s551_s23  ;;  %p556_p12 = scmp.lt.u32.totalorder %s782_s13, %s830_s1 }
 0x14b   : > { %p557_p1 = scmp.lt.u32.totalorder %s555_s27, %s551_s23  ;;  %p559_p8 = scmp.lt.u32.totalorder %s551_s23, %s782_s13 }
 0x14c   : > { %p553_p7 = pnand %p552_p6, %p838_p9 }
 0x14d   : > { %p558_p3 = por %p557_p1, %p556_p12 }
 0x14e   : > { %p554_p10 = pneg %p553_p7 }
 0x14f   : > { %p560_p11 = por %p559_p8, %p558_p3 }
 0x151   : > { %p561_p0 = pnand %p560_p11, %p554_p10 }
 0x153   : > { %564 = shalt.err (!%p561_p0)
}
 0x154   : > { %433 = dma.vmem_to_hbm [thread:$0]  (%p838_p9), %s777_s28, 128, %s782_s13, %s303_s15  }
 0x155 PF: > { %s329_s4 = sand.u32 1, %s599_s6   ;;  %p839_p5 = scmp.ne.s32.totalorder %s835_s21, 0 }
 0x156   : > { %p840_p13 = scmp.ge.s32.totalorder %s619_s11, 2  ;;  %s330_s18 = scalar_lea.sflag [#allocation4], %s329_s4 }
 0x158   : > { %p440_p2 = pnand %p840_p13, %p839_p5 }
 0x15a   : > { %594 = dma.done.wait (!%p440_p2), %s330_s18, 128  }
 0x15b   : > { %596 = vsyncadd (!%p440_p2), %s330_s18, 4294967168  ;;  %s17_s11 = sadd.s32 1, %s619_s11   ;;  %s841_s6 = smov %s603_s7 }
 0x15c   : > { %p14_p4 = scmp.ge.s32.totalorder %s17_s11, 4   ;;  %s842_s7 = smov %s607_s8 }
 0x15d   : > { %s843_s8 = smov %s691_s20  ;;  %s844_s9 = smov %s615_s10 }
 0x15e   : > { %s845_s10 = smov %s847_s14  ;;  %16 = sbr.rel (!%p14_p4) target bundleno = 6 (0x6), region = 86 }
 0x165   :  { %335 = vsyncpa [#allocation3], 1 }
 0x166   :  { %337 = vsyncpa [#allocation3 + $0x1], 1 }
 0x167   :  { %338 = vsyncpa [#allocation4], 1 }
 0x168   :  { %340 = vsyncpa [#allocation4 + $0x1], 1 }

</bundles_post_ra>
